<compile_context>
chip_gen: v6e
topology: v6e:2x2x1
jax: 0.10.0
libtpu: 0.0.40
codegen_flags: <defaults>
</compile_context>

<pallas_src>
import jax
import jax.numpy as jnp
from jax.experimental import pallas as pl
from jax.experimental.pallas import tpu as pltpu


# ------------------------------ kernel ---------------------------------------

def _lora_qkv_kernel(x_ref, w_ref, b_ref, a_ref, bb_ref, o_ref):
    # x_ref : (tm, C)    input dtype (f32/bf16) — row tile, streams
    # w_ref : (C, 3C)    bf16  qkv weight in (K, N) layout — VMEM resident
    # b_ref : (1, 3C)    f32   qkv bias — resident
    # a_ref : (C, 2r)    bf16  [A_q^T | A_v^T] — resident
    # bb_ref: (2r, 3C)   bf16  zero-padded [B_q^T ; B_v^T] — resident
    # o_ref : (tm, 3C)   bf16
    x = x_ref[...].astype(jnp.bfloat16)
    acc = jnp.dot(x, w_ref[...], preferred_element_type=jnp.float32)
    acc = acc + b_ref[...]
    # LoRA rank-2r epilogue (bf16 operands, f32 accumulation).
    xa = jnp.dot(x, a_ref[...], preferred_element_type=jnp.float32)       # (tm, 2r)
    acc = acc + jnp.dot(xa.astype(jnp.bfloat16), bb_ref[...],
                        preferred_element_type=jnp.float32)
    o_ref[...] = acc.astype(o_ref.dtype)


# ------------------------------ wrapper ---------------------------------------

def _round_up(x, m):
    return ((x + m - 1) // m) * m


def pack_params(w_qkv, b_qkv, a_q, b_q, a_v, b_v):
    """One-time layout prep (outside the hot path).

    w_qkv: (3C, C)  torch Linear weight      b_qkv: (3C,)
    a_q  : (r, C)   linear_a_q weight        b_q  : (C, r)  linear_b_q weight
    a_v  : (r, C)   linear_a_v weight        b_v  : (C, r)  linear_b_v weight
    """
    three_c, C = w_qkv.shape
    r = a_q.shape[0]
    b_cat = jnp.zeros((2 * r, three_c), jnp.float32)
    b_cat = b_cat.at[:r, :C].set(b_q.T.astype(jnp.float32))       # q columns
    b_cat = b_cat.at[r:, 2 * C:].set(b_v.T.astype(jnp.float32))   # v columns
    return {
        "w_kn": w_qkv.T.astype(jnp.bfloat16),                       # (C, 3C)
        "bias": b_qkv.reshape(1, three_c).astype(jnp.float32),      # (1, 3C)
        "a_cat": jnp.concatenate(
            [a_q.T, a_v.T], axis=1).astype(jnp.bfloat16),           # (C, 2r)
        "b_cat": b_cat.astype(jnp.bfloat16),                        # (2r, 3C)
    }


def _vmem_need_bytes(tm, C, three_c, r2, x_itemsize):
    return (2 * tm * C * x_itemsize      # x row tile, double buffered
            + 2 * tm * three_c * 2       # out tile (bf16), double buffered
            + C * three_c * 2            # resident qkv weight (bf16)
            + three_c * 4                # resident bias (f32)
            + C * r2 * 2                 # resident LoRA-A (bf16)
            + r2 * three_c * 2           # resident LoRA-B (bf16)
            + tm * three_c * 4           # f32 accumulator temp
            + tm * C * 2)                # bf16 cast of x tile


def lora_qkv_forward(x, packed):
    """x: (B, N, C) -> qkv: (B, N, 3C)  (bf16, matching the .half() module)."""
    B, N, C = x.shape
    M = B * N
    three_c = packed["w_kn"].shape[1]
    r2 = packed["a_cat"].shape[1]
    x_itemsize = jnp.dtype(x.dtype).itemsize

    # Row tile: 256-aligned (MXU-height friendly on v6e/v7x, multiple of 128
    # for v5e); pad M up instead of degrading the tile size.
    if M >= 256:
        tm = 256
    else:
        tm = _round_up(M, 8)

    # Conservative VMEM budget (v7x has 64 MiB/TC; leave room for pipelining).
    BUDGET = 40 * 1024 * 1024
    while _vmem_need_bytes(tm, C, three_c, r2, x_itemsize) > BUDGET and tm > 8:
        tm = max(8, tm // 2)

    M_pad = _round_up(M, tm)
    x2 = x.reshape(M, C)
    if M_pad != M:
        x2 = jnp.pad(x2, ((0, M_pad - M), (0, 0)))

    need = _vmem_need_bytes(tm, C, three_c, r2, x_itemsize)
    vmem_limit = min(need + (8 << 20), 48 << 20)

    cost = pl.CostEstimate(
        flops=2 * M_pad * three_c * (C + r2) + 2 * M_pad * r2 * C,
        transcendentals=0,
        bytes_accessed=(M_pad * C * x_itemsize        # x
                        + C * three_c * 2             # W
                        + three_c * 4                 # bias
                        + (C + three_c) * r2 * 2      # LoRA slabs
                        + M_pad * three_c * 2),       # out
    )

    out = pl.pallas_call(
        _lora_qkv_kernel,
        grid=(M_pad // tm,),
        in_specs=[
            pl.BlockSpec((tm, C), lambda i: (i, 0)),          # x row tile (streams)
            pl.BlockSpec((C, three_c), lambda i: (0, 0)),     # qkv weight (resident)
            pl.BlockSpec((1, three_c), lambda i: (0, 0)),     # bias (resident)
            pl.BlockSpec((C, r2), lambda i: (0, 0)),          # LoRA A (resident)
            pl.BlockSpec((r2, three_c), lambda i: (0, 0)),    # LoRA B (resident)
        ],
        out_specs=pl.BlockSpec((tm, three_c), lambda i: (i, 0)),
        out_shape=jax.ShapeDtypeStruct((M_pad, three_c), jnp.bfloat16),
        compiler_params=pltpu.CompilerParams(
            dimension_semantics=("parallel",),
            vmem_limit_bytes=int(vmem_limit),
        ),
        cost_estimate=cost,
    )(x2, packed["w_kn"], packed["bias"], packed["a_cat"], packed["b_cat"])

    return out[:M].reshape(B, N, three_c)


# ------------------------------ main -------------------------------------------

if __name__ == "__main__":
    B, N, C, r = 2, 8, 32, 4   # small shapes: batch=2, seq=8, dim=32, lora rank=4

    key = jax.random.PRNGKey(0)
    ks = jax.random.split(key, 7)
    x = jax.random.normal(ks[0], (B, N, C), jnp.float32)
    w_qkv = 0.02 * jax.random.normal(ks[1], (3 * C, C), jnp.float32)   # torch (out,in)
    b_qkv = 0.01 * jax.random.normal(ks[2], (3 * C,), jnp.float32)
    a_q = 0.1 * jax.random.normal(ks[3], (r, C), jnp.float32)
    b_q = 0.1 * jax.random.normal(ks[4], (C, r), jnp.float32)
    a_v = 0.1 * jax.random.normal(ks[5], (r, C), jnp.float32)
    b_v = 0.1 * jax.random.normal(ks[6], (C, r), jnp.float32)

    packed = pack_params(w_qkv, b_qkv, a_q, b_q, a_v, b_v)
    fwd = jax.jit(lora_qkv_forward)
    out = jax.block_until_ready(fwd(x, packed))

    # Pure-JAX f32 reference with torch-layout weights (semantics check).
    ref = jnp.einsum("bnc,oc->bno", x, w_qkv) + b_qkv
    new_q = jnp.einsum("bnr,cr->bnc", jnp.einsum("bnc,rc->bnr", x, a_q), b_q)
    new_v = jnp.einsum("bnr,cr->bnc", jnp.einsum("bnc,rc->bnr", x, a_v), b_v)
    ref = ref.at[:, :, :C].add(new_q)
    ref = ref.at[:, :, 2 * C:].add(new_v)

    assert out.shape == (B, N, 3 * C), out.shape
    assert bool(jnp.all(jnp.isfinite(out)))
    max_err = float(jnp.max(jnp.abs(out.astype(jnp.float32) - ref)))
    assert max_err < 5e-2, f"max abs error {max_err}"
    print("KERNEL_OK")
</pallas_src>

<mosaic_0001>
module attributes {stable_mosaic.version = 11 : i64} {
  func.func @_lora_qkv_kernel(%arg0: i32, %arg1: memref<16x32xf32, #tpu.memory_space<vmem>>, %arg2: memref<32x96xbf16, #tpu.memory_space<vmem>>, %arg3: memref<1x96xf32, #tpu.memory_space<vmem>>, %arg4: memref<32x8xbf16, #tpu.memory_space<vmem>>, %arg5: memref<8x96xbf16, #tpu.memory_space<vmem>>, %arg6: memref<16x96xbf16, #tpu.memory_space<vmem>>) attributes {dimension_semantics = [#tpu.dimension_semantics<parallel>], iteration_bounds = array<i64: 1>, scalar_prefetch = 0 : i64, scratch_operands = 0 : i64, tpu.core_type = #tpu.core_type<tc>, window_params = [{transform_indices = @transform_0, window_bounds = array<i64: 16, 32>}, {pipeline_mode = #tpu.pipeline_mode<synchronous>, transform_indices = @transform_1, window_bounds = array<i64: 32, 96>}, {pipeline_mode = #tpu.pipeline_mode<synchronous>, transform_indices = @transform_2, window_bounds = array<i64: 1, 96>}, {pipeline_mode = #tpu.pipeline_mode<synchronous>, transform_indices = @transform_3, window_bounds = array<i64: 32, 8>}, {pipeline_mode = #tpu.pipeline_mode<synchronous>, transform_indices = @transform_4, window_bounds = array<i64: 8, 96>}, {transform_indices = @transform_5, window_bounds = array<i64: 16, 96>}]} {
    %c0 = arith.constant 0 : index
    %c0_0 = arith.constant 0 : index
    %0 = vector.load %arg1[%c0, %c0_0] : memref<16x32xf32, #tpu.memory_space<vmem>>, vector<16x32xf32>
    %1 = arith.truncf %0 : vector<16x32xf32> to vector<16x32xbf16>
    %c0_1 = arith.constant 0 : index
    %c0_2 = arith.constant 0 : index
    %2 = vector.load %arg2[%c0_1, %c0_2] : memref<32x96xbf16, #tpu.memory_space<vmem>>, vector<32x96xbf16>
    %cst = arith.constant dense<0.000000e+00> : vector<16x96xf32>
    %3 = tpu.matmul %1, %2, %cst {dimension_numbers = #tpu.dot_dimension_numbers<[1], [0], [0], [1], [0, 0, 1, 1], [], []>} : vector<16x32xbf16>, vector<32x96xbf16>, vector<16x96xf32> -> vector<16x96xf32>
    %c0_3 = arith.constant 0 : index
    %c0_4 = arith.constant 0 : index
    %4 = vector.load %arg3[%c0_3, %c0_4] : memref<1x96xf32, #tpu.memory_space<vmem>>, vector<1x96xf32>
    %5 = vector.broadcast %4 : vector<1x96xf32> to vector<16x96xf32>
    %6 = arith.addf %3, %5 : vector<16x96xf32>
    %c0_5 = arith.constant 0 : index
    %c0_6 = arith.constant 0 : index
    %7 = vector.load %arg4[%c0_5, %c0_6] : memref<32x8xbf16, #tpu.memory_space<vmem>>, vector<32x8xbf16>
    %cst_7 = arith.constant dense<0.000000e+00> : vector<16x8xf32>
    %8 = tpu.matmul %1, %7, %cst_7 {dimension_numbers = #tpu.dot_dimension_numbers<[1], [0], [0], [1], [0, 0, 1, 1], [], []>} : vector<16x32xbf16>, vector<32x8xbf16>, vector<16x8xf32> -> vector<16x8xf32>
    %9 = arith.truncf %8 : vector<16x8xf32> to vector<16x8xbf16>
    %c0_8 = arith.constant 0 : index
    %c0_9 = arith.constant 0 : index
    %10 = vector.load %arg5[%c0_8, %c0_9] : memref<8x96xbf16, #tpu.memory_space<vmem>>, vector<8x96xbf16>
    %cst_10 = arith.constant dense<0.000000e+00> : vector<16x96xf32>
    %11 = tpu.matmul %9, %10, %cst_10 {dimension_numbers = #tpu.dot_dimension_numbers<[1], [0], [0], [1], [0, 0, 1, 1], [], []>} : vector<16x8xbf16>, vector<8x96xbf16>, vector<16x96xf32> -> vector<16x96xf32>
    %12 = arith.addf %6, %11 : vector<16x96xf32>
    %13 = arith.truncf %12 : vector<16x96xf32> to vector<16x96xbf16>
    %c0_11 = arith.constant 0 : index
    %c0_12 = arith.constant 0 : index
    %14 = vector.load %arg6[%c0_11, %c0_12] : memref<16x96xbf16, #tpu.memory_space<vmem>>, vector<16x96xbf16>
    tpu.vector_store %arg6[%c0_11, %c0_12], %13 {strides = array<i32>} : memref<16x96xbf16, #tpu.memory_space<vmem>>, vector<16x96xbf16>,
    return
  }
  func.func @transform_0(%arg0: i32) -> (i32, i32) {
    %c0_i32 = arith.constant 0 : i32
    %c0_i32_0 = arith.constant 0 : i32
    return %arg0, %c0_i32 : i32, i32
  }
  func.func @transform_1(%arg0: i32) -> (i32, i32) {
    %c0_i32 = arith.constant 0 : i32
    %c0_i32_0 = arith.constant 0 : i32
    %c0_i32_1 = arith.constant 0 : i32
    return %c0_i32, %c0_i32_0 : i32, i32
  }
  func.func @transform_2(%arg0: i32) -> (i32, i32) {
    %c0_i32 = arith.constant 0 : i32
    %c0_i32_0 = arith.constant 0 : i32
    %c0_i32_1 = arith.constant 0 : i32
    return %c0_i32, %c0_i32_0 : i32, i32
  }
  func.func @transform_3(%arg0: i32) -> (i32, i32) {
    %c0_i32 = arith.constant 0 : i32
    %c0_i32_0 = arith.constant 0 : i32
    %c0_i32_1 = arith.constant 0 : i32
    return %c0_i32, %c0_i32_0 : i32, i32
  }
  func.func @transform_4(%arg0: i32) -> (i32, i32) {
    %c0_i32 = arith.constant 0 : i32
    %c0_i32_0 = arith.constant 0 : i32
    %c0_i32_1 = arith.constant 0 : i32
    return %c0_i32, %c0_i32_0 : i32, i32
  }
  func.func @transform_5(%arg0: i32) -> (i32, i32) {
    %c0_i32 = arith.constant 0 : i32
    %c0_i32_0 = arith.constant 0 : i32
    return %arg0, %c0_i32 : i32, i32
  }
}

</mosaic_0001>

<bundles_post_ra>
// kernel: lora_qkv_forward.1
= control target key start
LH: loop header
LB: loop body
LE: loop exit
PB: predicated region body
PF: predicated region fallthrough
CT: control target
= control target key end

     0   :  { %10 = vsyncpa [#allocation3], 0  ;;  %s410_s0 = inlined_call_operand.vmem [shape: f32[16,32], index: 0, kind: input, shape index: {}]   ;;  %s411_s1 = inlined_call_operand.hbm [shape: bf16[32,96], index: 1, kind: input, shape index: {}]   ;;  %s412_s2 = inlined_call_operand.vmem [shape: f32[1,96], index: 2, kind: input, shape index: {}]   ;;  %s413_s3 = inlined_call_operand.vmem [shape: bf16[32,8], index: 3, kind: input, shape index: {}]   ;;  %s414_s4 = inlined_call_operand.vmem [shape: bf16[8,96], index: 4, kind: input, shape index: {}]   ;;  %s415_s5 = inlined_call_operand.hbm [shape: bf16[16,96], index: 5, kind: output, shape index: {}]  }
   0x1   :  { %11 = vsyncpa [#allocation4], 0  ;;  %s341_s18 = smov [#allocation2]  }
   0x2   :  { %s19_s19 = sshll.u32 %s341_s18, 4  ;;  %s20_s19 = int_to_ptr.vmem [resolvable:$true] %s19_s19 }
   0x3   :  { %s305_s20 = scalar_lea.vmem %s20_s19, 256  ;;  %p310_p1 = scmp.lt.s32.totalorder %s20_s19, %s20_s19 }
   0x4   :  { %p306_p0 = scmp.ne.s32.totalorder %s20_s19, %s305_s20  ;;  %p311_p2 = scmp.lt.s32.totalorder %s305_s20, %s305_s20 }
   0x6   :  { %p312_p3 = por %p311_p2, %p310_p1 }
   0x8   :  { %p313_p4 = pnand %p312_p3, %p306_p0 }
   0xa   :  { %316 = shalt.err (!%p313_p4)
}
   0xb   :  { %s342_s21 = smov 64   ;;  %s343_s22 = smov 4  }
   0xc   :  { %25 = dma.hbm_to_vmem [thread:$0]  %s411_s1, 256, %s20_s19, [#allocation3], %s342_s21, %s342_s21, %s343_s22  }
   0xd   :  { %337 = dma.done.wait [#allocation3], 256  }
   0xe   :  { %338 = vsyncadd [#allocation3], 4294967040  ;;  %v344_v0 = vmov 0.0   ;;  %vm345_vm0 = vmmov 0   ;;  %v293_v1 = vld [vmem:[%s413_s3 + $0x8] sm:$0xff]   ;;  %v294_v2 = vld [vmem:[%s413_s3] sm:$0xff]  }
   0xf   :  { %273 = vmatprep.subr.bf16.mxu1 %v344_v0  ;;  %277 = vmatprep.mubr.msk.bf16.mxu1 %vm345_vm0, %v344_v0  ;;  %v36_v3 = vld [vmem:[%s410_s0] sm:$0xff]  ;;  %v37_v4 = vld [vmem:[%s410_s0 + $0x8] sm:$0xff]  ;;  %vm62_vm1 = vcmask 261120   ;;  %vm170_vm2 = vcmask 1043456   ;;  %vm166_vm3 = vcmask 64512   ;;  %vm225_vm4 = vcmask 781312  }
  0x10   :  { %265 = vmatprep.subr.bf16.mxu0 %v344_v0  ;;  %269 = vmatprep.mubr.msk.bf16.mxu0 %vm345_vm0, %v344_v0  ;;  %v295_v5 = vld [vmem:[#allocation2 + $0x8] sm:$0xff]   ;;  %v38_v6 = vpack.c.bf16 %v37_v4, %v36_v3  ;;  %v296_v7 = vld [vmem:[#allocation2] sm:$0xff]  }
  0x11   :  { %274 = vmatpush3.bf16.msra.mxu1 %v293_v1  ;;  %266 = vmatpush3.bf16.msra.mxu0 %v295_v5  ;;  %v165_v8 = vld [vmem:[%s414_s4] sm:$0xf]  ;;  %s346_s4 = smov [#allocation5]  }
  0x12   :  { %275 = vmatprep.subr.bf16.mxu1 %v344_v0  ;;  %267 = vmatprep.subr.bf16.mxu0 %v344_v0  ;;  %v172_v9 = vsel %vm170_vm2, %v165_v8, 0  ;;  %v245_v19 = vld [vmem:[%s412_s2] ss:$0 sm:$0xff]  ;;  %s233_s9 = sshll.u32 %s346_s4, 4  ;;  %s234_s9 = int_to_ptr.vmem [resolvable:$true] %s233_s9 }
  0x13   :  { %s317_s10 = scalar_lea.vmem %s234_s9, 128  ;;  %p322_p6 = scmp.lt.s32.totalorder %s234_s9, %s234_s9 }
  0x14   :  { %p318_p5 = scmp.ne.s32.totalorder %s234_s9, %s317_s10  ;;  %p323_p7 = scmp.lt.s32.totalorder %s317_s10, %s317_s10 }
  0x15   :  { %276 = vmatpush3.bf16.msra.mxu1 %v294_v2  ;;  %268 = vmatpush3.bf16.msra.mxu0 %v296_v7 }
  0x16   :  { %281 = vmatprep.subr.bf16.mxu0 %v344_v0  ;;  %p324_p8 = por %p323_p7, %p322_p6 }
  0x18   :  { %278 = vmatmul.mubr.msk.bf16.vlgmr.msra.gmra.mxu1 %vm62_vm1, %v38_v6  ;;  %270 = vmatmul.mubr.msk.bf16.vlgmr.msra.gmra.mxu0 %vm62_vm1, %v38_v6  ;;  %p325_p9 = pnand %p324_p8, %p318_p5 }
  0x19   :  { %282 = vmatpush3.bf16.msra.mxu0 %v172_v9  ;;  %283 = vmatprep.mubr.msk.bf16.mxu0 %vm345_vm0, %v344_v0 }
  0xd8   :  { %v157_v10 = vpop.f32.mrf.mxu1  ;;  %v100_v12 = vpop.f32.mrf.mxu0 }
  0xd9   :  { %v101_v20 = vadd.f32 %v245_v19, %v100_v12 }
  0xda   :  { %v279_v11 = vpop.f32.mrf.mxu1  ;;  %v271_v15 = vpop.f32.mrf.mxu0 }
  0xdc   :  { %v160_v13 = vpop.f32.mrf.mxu1  ;;  %v103_v17 = vpop.f32.mrf.mxu0 }
  0xdd   :  { %v164_v14 = vpack.c.bf16 %v160_v13, %v157_v10  ;;  %v104_v24 = vadd.f32 %v245_v19, %v103_v17 }
  0xde   :  { %v280_v16 = vpop.f32.mrf.mxu1  ;;  %v272_v18 = vpop.f32.mrf.mxu0 }
  0xdf   :  { %284 = vmatmul.mubr.msk.bf16.vlgmr.msra.gmra.mxu0 %vm166_vm3, %v164_v14 }
 0x19f   :  { %v208_v21 = vpop.f32.mrf.mxu0 }
 0x1a0   :  { %v215_v22 = vadd.f32 %v208_v21, %v101_v20 }
 0x1a1   :  { %v285_v23 = vpop.f32.mrf.mxu0 }
 0x1a2   :  { %v255_v25 = vpack.c.bf16 %v215_v22, %v215_v22 }
 0x1a3   :  { %v211_v26 = vpop.f32.mrf.mxu0 }
 0x1a4   :  { %v216_v27 = vadd.f32 %v211_v26, %v104_v24  ;;  %226 = vst.msk [vmem:[#allocation5] sm:$0xf] %vm225_vm4, %v255_v25 }
 0x1a5   :  { %v286_v28 = vpop.f32.mrf.mxu0 }
 0x1a6   :  { %v256_v29 = vpack.c.bf16 %v216_v27, %v216_v27 }
 0x1a8   :  { %227 = vst.msk [vmem:[#allocation5 + $0x4] sm:$0xf] %vm225_vm4, %v256_v29 }
 0x1a9   :  { %328 = shalt.err (!%p325_p9)
}
 0x1aa   :  { %239 = dma.vmem_to_hbm [thread:$0]  %s234_s9, 128, %s415_s5, [#allocation4], %s342_s21, %s342_s21, %s343_s22  }
 0x1ab   :  { %339 = dma.done.wait [#allocation4], 128  }
 0x1ac   :  { %340 = vsyncadd [#allocation4], 4294967168 }
 0x1ad   :  { %243 = vsyncpa [#allocation3], 1 }
 0x1ae   :  { %244 = vsyncpa [#allocation4], 1 }

</bundles_post_ra>
